<compile_context>
chip_gen: v7x
topology: tpu7x:2x2x1
jax: 0.10.0
libtpu: 0.0.40
codegen_flags: <defaults>
</compile_context>

<pallas_src>
import functools

import numpy as np
import jax
import jax.numpy as jnp
from jax import lax
from jax.experimental import pallas as pl
from jax.experimental.pallas import tpu as pltpu


def _aa_down_kernel(x_ref, r_ref, c_ref, o_ref, *, c_tile, H, W, H_out, W_out):
    """c_tile depthwise planes: out[c] = Rmat @ x[c] @ Cmat (blur + ::s fused).

    x_ref : (c_tile, H, W)         input planes, original (narrow) dtype
    r_ref : (H_out, H)             row projection, same dtype as x
    c_ref : (W, W_out)             col projection, same dtype as x
    o_ref : (c_tile, H_out, W_out) output planes
    """
    x = x_ref[...]                      # keep input dtype: bf16 feeds the MXU natively
    rmat = r_ref[...]
    cmat = c_ref[...]

    # Column pass: all planes in one MXU matmul, (c_tile*H, W) @ (W, W_out), f32 accumulate.
    # The (c_tile, H) -> c_tile*H merge leaves the lane dim untouched (free reshape).
    y = jnp.dot(x.reshape(c_tile * H, W), cmat, preferred_element_type=jnp.float32)
    y = y.astype(x.dtype)               # back to narrow dtype for the second MXU pass

    if c_tile == 1:
        out = jnp.dot(rmat, y, preferred_element_type=jnp.float32)       # (H_out, W_out)
        o_ref[...] = out.reshape(1, H_out, W_out).astype(o_ref.dtype)
    else:
        # Row pass: one batched contraction (single dot_general issue) + ONE store,
        # instead of a Python loop of c_tile tiny matmuls + c_tile masked stores.
        y3 = y.reshape(c_tile, H, W_out)
        rmat_b = jnp.broadcast_to(rmat[None], (c_tile, H_out, H))        # hoisted, once/step
        out = jnp.einsum('coh,chw->cow', rmat_b, y3,
                         preferred_element_type=jnp.float32)             # (c_tile, H_out, W_out)
        o_ref[...] = out.astype(o_ref.dtype)


class AntiAliasDownsample2d:
    """Band-limited 2D downsampling (JAX/Pallas port of the PyTorch module)."""

    def __init__(self, channels, scale):
        assert scale <= 1
        self.scale = scale
        self.channels = channels
        sigma = (1 / scale - 1) / 2
        ksize = 2 * round(sigma * 4) + 1
        self.ka = ksize // 2
        self.kb = self.ka - 1 if ksize % 2 == 0 else self.ka
        self.ksize = ksize
        self.int_inv_scale = int(1 / scale)
        if scale == 1.0:
            self.taps = None
            self.weight = None
            return
        # Deterministic, channel-invariant Gaussian taps (same construction as the PyTorch
        # buffer).  Normalizing the 1-D taps == normalizing the 2-D outer product.
        coords = np.arange(ksize, dtype=np.float64)
        mean = (ksize - 1) / 2
        g = np.exp(-((coords - mean) ** 2) / (2 * sigma ** 2))
        g = g / g.sum()
        self.taps = g.astype(np.float32)
        # 2-D per-channel kernel kept only for the pure-JAX reference check.
        k2d = np.outer(self.taps, self.taps).astype(np.float32)
        self.weight = jnp.asarray(np.broadcast_to(k2d, (channels, ksize, ksize)).copy())

    @staticmethod
    def _projection(n_in, s, taps, ka):
        """(n_out, n_in) matrix: zero-padded blur + [::s] subsample along one axis."""
        n_out = -(-n_in // s)
        K = taps.shape[0]
        m = np.zeros((n_out, n_in), dtype=np.float32)
        for o in range(n_out):
            for i in range(K):
                src = o * s + i - ka
                if 0 <= src < n_in:       # taps that fall in the zero pad are dropped
                    m[o, src] += taps[i]
        return m

    @staticmethod
    def _vmem_capacity_bytes():
        try:
            return int(pltpu.get_tpu_info().vmem_capacity_bytes)
        except Exception:
            return 64 * 1024 * 1024       # conservative: v7x per-TensorCore VMEM

    @staticmethod
    def _pick_c_tile(num_planes, footprint, budget, max_tile=64):
        """Largest divisor of num_planes whose real per-step footprint fits the budget,
        preferring >=4 grid steps with an even count (>=2 steps per v7x TensorCore)."""
        divs = [d for d in range(1, min(num_planes, max_tile) + 1) if num_planes % d == 0]
        for min_steps, need_even in ((4, True), (2, False)):
            ok = [d for d in divs
                  if num_planes // d >= min_steps
                  and (not need_even or (num_planes // d) % 2 == 0)
                  and footprint(d) <= budget]
            if ok:
                return max(ok)
        ok = [d for d in divs if footprint(d) <= budget]
        return max(ok) if ok else 1

    def __call__(self, x):
        if self.scale == 1.0:
            return x
        N, C, H, W = x.shape
        assert C == self.channels
        assert jnp.issubdtype(x.dtype, jnp.floating)
        s = self.int_inv_scale
        H_out = -(-H // s)
        W_out = -(-W // s)
        num_planes = N * C

        # Projection matrices in the compute dtype (= input dtype: bf16 in -> bf16 MXU,
        # f32 in -> exact f32 math; no in-kernel upcast pass, half the DMA for bf16).
        cdt = x.dtype
        rmat = jnp.asarray(self._projection(H, s, self.taps, self.ka), dtype=cdt)      # (H_out, H)
        cmat = jnp.asarray(self._projection(W, s, self.taps, self.ka).T, dtype=cdt)    # (W, W_out)

        in_b = x.dtype.itemsize
        cb = jnp.dtype(cdt).itemsize

        def footprint(ct):
            x_blk = 2 * ct * H * W * in_b                 # double-buffered input block
            o_blk = 2 * ct * H_out * W_out * in_b         # double-buffered output block
            mats = 2 * (H_out * H + W * W_out) * cb       # rmat/cmat blocks
            y_f32 = ct * H * W_out * 4                    # column-pass f32 accumulator
            y_low = ct * H * W_out * cb                   # narrow copy fed to row pass
            r_bc = ct * H_out * H * cb                    # broadcast rmat for batched dot
            o_f32 = ct * H_out * W_out * 4                # row-pass f32 result
            return x_blk + o_blk + mats + y_f32 + y_low + r_bc + o_f32

        vmem_cap = self._vmem_capacity_bytes()
        # ~<=24 MiB/step on v7x (64 MiB VMEM), up to 48 MiB/step on v5e/v6e (128 MiB).
        budget = min(48 << 20, max(vmem_cap // 2 - (8 << 20), 16 << 20))
        c_tile = self._pick_c_tile(num_planes, footprint, budget)
        grid = (num_planes // c_tile,)
        vmem_limit = int(min(0.9 * vmem_cap,
                             max(1.5 * footprint(c_tile) + (8 << 20), 32 << 20)))

        # Free view of NCHW as independent depthwise planes; no pad / no dtype cast in HBM.
        x_flat = x.reshape(num_planes, H, W)

        kernel = functools.partial(_aa_down_kernel, c_tile=c_tile,
                                   H=H, W=W, H_out=H_out, W_out=W_out)
        out = pl.pallas_call(
            kernel,
            out_shape=jax.ShapeDtypeStruct((num_planes, H_out, W_out), x.dtype),
            grid_spec=pltpu.PrefetchScalarGridSpec(
                num_scalar_prefetch=0,
                grid=grid,
                in_specs=[
                    pl.BlockSpec((c_tile, H, W), lambda i: (i, 0, 0)),
                    pl.BlockSpec((H_out, H), lambda i: (0, 0)),
                    pl.BlockSpec((W, W_out), lambda i: (0, 0)),
                ],
                out_specs=pl.BlockSpec((c_tile, H_out, W_out), lambda i: (i, 0, 0)),
            ),
            compiler_params=pltpu.CompilerParams(
                dimension_semantics=("parallel",),
                vmem_limit_bytes=vmem_limit),
        )(x_flat, rmat, cmat)

        return out.reshape(N, C, H_out, W_out)


def _reference(x, weight, ka, kb, s):
    """Pure-JAX reference: zero-pad, depthwise conv (groups=C), then [::s, ::s]."""
    C = x.shape[1]
    x_pad = jnp.pad(x, ((0, 0), (0, 0), (ka, kb), (ka, kb)))
    w = weight[:, None]  # (C, 1, K, K) — OIHW with I=1 per group
    out = lax.conv_general_dilated(
        x_pad, w, window_strides=(1, 1), padding="VALID",
        dimension_numbers=("NCHW", "OIHW", "NCHW"),
        feature_group_count=C)
    return out[:, :, ::s, ::s]


if __name__ == "__main__":
    key = jax.random.PRNGKey(0)
    N, C, H, W = 2, 4, 16, 16
    scale = 0.5  # -> sigma=0.5, 5x5 Gaussian, stride-2 subsample

    x = jax.random.normal(key, (N, C, H, W), dtype=jnp.float32)

    mod = AntiAliasDownsample2d(C, scale)
    y = jax.block_until_ready(mod(x))

    y_ref = _reference(x, mod.weight, mod.ka, mod.kb, mod.int_inv_scale)
    assert y.shape == y_ref.shape == (N, C, H // 2, W // 2), (y.shape, y_ref.shape)
    assert jnp.allclose(y, y_ref, atol=1e-5, rtol=1e-5), float(jnp.max(jnp.abs(y - y_ref)))

    print("KERNEL_OK")
</pallas_src>

<mosaic_0001>
module attributes {stable_mosaic.version = 11 : i64} {
  func.func @_aa_down_kernel(%arg0: i32, %arg1: memref<2x16x16xf32, #tpu.memory_space<vmem>>, %arg2: memref<8x16xf32, #tpu.memory_space<vmem>>, %arg3: memref<16x8xf32, #tpu.memory_space<vmem>>, %arg4: memref<2x8x8xf32, #tpu.memory_space<vmem>>) attributes {dimension_semantics = [#tpu.dimension_semantics<parallel>], iteration_bounds = array<i64: 4>, scalar_prefetch = 0 : i64, scratch_operands = 0 : i64, tpu.core_type = #tpu.core_type<tc>, window_params = [{transform_indices = @transform_0, window_bounds = array<i64: 2, 16, 16>}, {pipeline_mode = #tpu.pipeline_mode<synchronous>, transform_indices = @transform_1, window_bounds = array<i64: 8, 16>}, {pipeline_mode = #tpu.pipeline_mode<synchronous>, transform_indices = @transform_2, window_bounds = array<i64: 16, 8>}, {transform_indices = @transform_3, window_bounds = array<i64: 2, 8, 8>}]} {
    %c0 = arith.constant 0 : index
    %c0_0 = arith.constant 0 : index
    %c0_1 = arith.constant 0 : index
    %0 = vector.load %arg1[%c0, %c0_0, %c0_1] : memref<2x16x16xf32, #tpu.memory_space<vmem>>, vector<2x16x16xf32>
    %c0_2 = arith.constant 0 : index
    %c0_3 = arith.constant 0 : index
    %1 = vector.load %arg2[%c0_2, %c0_3] : memref<8x16xf32, #tpu.memory_space<vmem>>, vector<8x16xf32>
    %c0_4 = arith.constant 0 : index
    %c0_5 = arith.constant 0 : index
    %2 = vector.load %arg3[%c0_4, %c0_5] : memref<16x8xf32, #tpu.memory_space<vmem>>, vector<16x8xf32>
    %3 = vector.shape_cast %0 : vector<2x16x16xf32> to vector<32x16xf32>
    %cst = arith.constant dense<0.000000e+00> : vector<32x8xf32>
    %4 = tpu.matmul %3, %2, %cst {dimension_numbers = #tpu.dot_dimension_numbers<[1], [0], [0], [1], [0, 0, 1, 1], [], []>} : vector<32x16xf32>, vector<16x8xf32>, vector<32x8xf32> -> vector<32x8xf32>
    %5 = vector.shape_cast %4 : vector<32x8xf32> to vector<2x16x8xf32>
    %6 = vector.shape_cast %1 : vector<8x16xf32> to vector<1x8x16xf32>
    %7 = vector.shape_cast %6 : vector<1x8x16xf32> to vector<1x8x16xf32>
    %8 = vector.broadcast %7 : vector<1x8x16xf32> to vector<2x8x16xf32>
    "tpu.trace_start"() <{level = 10 : i32, message = "coh,chw->cow"}> : () -> ()
    %cst_6 = arith.constant dense<0.000000e+00> : vector<2x8x8xf32>
    %9 = tpu.matmul %8, %5, %cst_6 {dimension_numbers = #tpu.dot_dimension_numbers<[2], [1], [1], [2], [0, 0, 0, 1, 1, 2], [0], [0]>} : vector<2x8x16xf32>, vector<2x16x8xf32>, vector<2x8x8xf32> -> vector<2x8x8xf32>
    "tpu.trace_stop"() : () -> ()
    %c0_7 = arith.constant 0 : index
    %c0_8 = arith.constant 0 : index
    %c0_9 = arith.constant 0 : index
    %10 = vector.load %arg4[%c0_7, %c0_8, %c0_9] : memref<2x8x8xf32, #tpu.memory_space<vmem>>, vector<2x8x8xf32>
    tpu.vector_store %arg4[%c0_7, %c0_8, %c0_9], %9 {strides = array<i32>} : memref<2x8x8xf32, #tpu.memory_space<vmem>>, vector<2x8x8xf32>,
    return
  }
  func.func @transform_0(%arg0: i32) -> (i32, i32, i32) {
    %c0_i32 = arith.constant 0 : i32
    %c0_i32_0 = arith.constant 0 : i32
    %c0_i32_1 = arith.constant 0 : i32
    return %arg0, %c0_i32, %c0_i32_0 : i32, i32, i32
  }
  func.func @transform_1(%arg0: i32) -> (i32, i32) {
    %c0_i32 = arith.constant 0 : i32
    %c0_i32_0 = arith.constant 0 : i32
    %c0_i32_1 = arith.constant 0 : i32
    return %c0_i32, %c0_i32_0 : i32, i32
  }
  func.func @transform_2(%arg0: i32) -> (i32, i32) {
    %c0_i32 = arith.constant 0 : i32
    %c0_i32_0 = arith.constant 0 : i32
    %c0_i32_1 = arith.constant 0 : i32
    return %c0_i32, %c0_i32_0 : i32, i32
  }
  func.func @transform_3(%arg0: i32) -> (i32, i32, i32) {
    %c0_i32 = arith.constant 0 : i32
    %c0_i32_0 = arith.constant 0 : i32
    %c0_i32_1 = arith.constant 0 : i32
    return %arg0, %c0_i32, %c0_i32_0 : i32, i32, i32
  }
}

</mosaic_0001>

<bundles_post_ra>
// kernel: tpu_custom_call.1
= control target key start
LH: loop header
LB: loop body
LE: loop exit
PB: predicated region body
PF: predicated region fallthrough
CT: control target
= control target key end

     0   :  { %8 = vsyncpa [#allocation3], 0  ;;  %s956_s0 = inlined_call_operand.hbm [shape: f32[8,16,16], index: 0, kind: input, shape index: {}]   ;;  %s957_s1 = inlined_call_operand.vmem [shape: f32[8,16], index: 1, kind: input, shape index: {}]   ;;  %s958_s2 = inlined_call_operand.vmem [shape: f32[16,8], index: 2, kind: input, shape index: {}]   ;;  %s959_s3 = inlined_call_operand.hbm [shape: f32[8,8,8], index: 3, kind: output, shape index: {}]  }
   0x1   :  { %10 = vsyncpa [#allocation3 + $0x1], 0 }
   0x2   :  { %11 = vsyncpa [#allocation4], 0 }
   0x3   :  { %13 = vsyncpa [#allocation4 + $0x1], 0  ;;  %s780_s12 = smov 0   ;;  %s782_s13 = smov 0  }
   0x4   :  { %s784_s14 = smov 0   ;;  %s786_s15 = smov 0  }
   0x5 LB: > { %s801_s16 = sadd.s32 4294967295, %s749_s15   ;;  %s530_s17 = sadd.s32 4294967294, %s749_s15   ;;  %s749_s15 = sphi %s786_s15, %s971_s15   ;;  %s745_s14 = sphi %s784_s14, %s970_s14   ;;  %s741_s13 = sphi %s782_s13, %s969_s13   ;;  %s737_s12 = sphi %s780_s12, %s968_s12  }
   0x6   : > { %s805_s18 = sadd.s32 1, %s749_s15   ;;  %s26_s19 = sadd.s32 1, %s745_s14 }
   0x7   : > { %s23_s20 = ssub.s32 %s749_s15, %s805_s18  ;;  %p33_p0 = scmp.ne.s32.totalorder %s745_s14, %s741_s13 }
   0x8   : > { %p24_p1 = scmp.eq.s32.totalorder %s23_s20, 0  ;;  %p34_p2 = scmp.eq.s32.totalorder %s749_s15, 0 }
   0x9   : > { %p39_p3 = scmp.ne.s32.totalorder %s741_s13, %s737_s12  ;;  %p40_p4 = scmp.eq.s32.totalorder %s801_s16, 0 }
   0xa   : > { %s817_s21 = scalar_select %p24_p1, %s745_s14, %s26_s19  }
   0xb   : > { %p819_p5 = por %p34_p2, %p33_p0  ;;  %p823_p6 = por %p40_p4, %p39_p3 }
   0xc   : > { %p105_p7 = scmp.eq.s32.totalorder %s801_s16, 3  ;;  %p111_p8 = scmp.eq.s32.totalorder %s530_s17, 3 }
   0xd   : > { %p612_p9 = scmp.lt.s32.totalorder %s749_s15, 4  ;;  %s137_s26 = sand.u32 1, %s745_s14  }
   0xe   : > { %p829_p10 = por %p105_p7, %p33_p0  ;;  %p833_p11 = por %p111_p8, %p39_p3 }
   0xf   : > { %s552_s27 = sshll.u32 %s749_s15, 9  ;;  %s533_s28 = sshll.u32 %s137_s26, 5 }
  0x10   : > { %s963_s24 = scalar_select %p829_p10, 1, 0 }
  0x11   : > { %s964_s25 = scalar_select %p833_p11, 1, 0 }
  0x12   : > { %s842_s4 = scalar_lea.hbm %s956_s0, %s552_s27  ;;  %s141_s5 = scalar_lea.vmem [#allocation2], %s533_s28 }
  0x13   : > { %s149_s6 = sshll.u32 %s141_s5, 4  ;;  %p846_p12 = pnand %p612_p9, %p819_p5  ;;  %s850_s6 = int_to_ptr.vmem [resolvable:$true] %s149_s6 }
  0x14   : > { %s852_s8 = scalar_lea.sflag [#allocation3], %s137_s26  ;;  %s653_s9 = scalar_lea.hbm %s842_s4, 512 }
  0x15   : > { %p654_p13 = scmp.ne.s32.totalorder %s842_s4, %s653_s9  ;;  %p655_p0 = pneg %p846_p12 }
  0x16   : > { %s658_s17 = scalar_lea.hbm %s956_s0, 2048  ;;  %p659_p3 = scmp.lt.u32.totalorder %s842_s4, %s956_s0 }
  0x17   : > { %p656_p1 = pnand %p655_p0, %p654_p13  ;;  %p660_p4 = scmp.lt.u32.totalorder %s658_s17, %s653_s9 }
  0x18   : > { %p662_p7 = scmp.lt.u32.totalorder %s653_s9, %s842_s4 }
  0x19   : > { %p657_p2 = pneg %p656_p1  ;;  %p661_p5 = por %p660_p4, %p659_p3 }
  0x1b   : > { %p663_p8 = por %p662_p7, %p661_p5 }
  0x1d   : > { %p664_p9 = pnand %p663_p8, %p657_p2 }
  0x1f   : > { %667 = shalt.err (!%p664_p9)
}
  0x20   : > { %s668_s22 = scalar_lea.vmem %s850_s6, 512  ;;  %s751_s26 = smov [#allocation2]  }
  0x21   : > { %p669_p13 = scmp.ne.s32.totalorder %s850_s6, %s668_s22  ;;  %s673_s27 = sshll.u32 %s751_s26, 4  ;;  %s674_s27 = int_to_ptr.vmem [resolvable:$false] %s673_s27 }
  0x22   : > { %s675_s28 = scalar_lea.vmem %s674_s27, 1024  ;;  %p676_p10 = scmp.lt.s32.totalorder %s850_s6, %s674_s27 }
  0x23   : > { %p671_p1 = pnand %p669_p13, %p655_p0  ;;  %p677_p3 = scmp.lt.s32.totalorder %s675_s28, %s668_s22 }
  0x25   : > { %p672_p11 = pneg %p671_p1  ;;  %p678_p4 = por %p677_p3, %p676_p10 }
  0x27   : > { %p679_p5 = pnand %p678_p4, %p672_p11 }
  0x29   : > { %682 = shalt.err (!%p679_p5)
}
  0x2a   : > { %s752_s29 = smov 128   ;;  %s753_s30 = smov 8  }
  0x2b   : > { %607 = dma.hbm_to_vmem [thread:$0]  (!%p846_p12), %s842_s4, 512, %s850_s6, %s852_s8, %s752_s29, %s752_s29, %s753_s30  }
  0x2c   : > { %p537_p0 = scmp.ge.s32.totalorder %s749_s15, 1  ;;  %p157_p2 = scmp.lt.s32.totalorder %s749_s15, 5 }
  0x2e   : > { %p158_p7 = pnand %p537_p0, %p157_p2 }
  0x2f   : > { %s883_s5 = sand.u32 (!%p158_p7), 1, %s741_s13  }
  0x30   : > { %161 = sbr.rel (%p158_p7) target bundleno = 512 (0x200), region = 32  ;;  %s538_s9 = sshll.u32 (!%p158_p7), %s883_s5, 5 }
  0x31   : > { %s164_s10 = scalar_lea.sflag (!%p158_p7), [#allocation3], %s883_s5  ;;  %s167_s11 = scalar_lea.vmem (!%p158_p7), [#allocation2], %s538_s9 }
  0x37   : > { %728 = dma.done.wait (%p823_p6), %s164_s10, 512  }
  0x38   : > { %730 = vsyncadd (%p823_p6), %s164_s10, 4294966784  ;;  %vm199_vm0 = vcmask 130048   ;;  %v197_v0 = vld [vmem:[%s958_s2] sm:$0xff]  ;;  %v198_v1 = vld [vmem:[%s958_s2 + $0x8] sm:$0xff]  ;;  %v754_v7 = vmov 0.0|0.0   ;;  %vm755_vm1 = vmmov 0  }
  0x39   : > { %v192_v2 = vld [vmem:[%s167_s11] sm:$0xff]  ;;  %v590_v3 = vpack.c.bf16 %v198_v1, %v197_v0  ;;  %v193_v4 = vld [vmem:[%s167_s11 + $0x8] sm:$0xff]  ;;  %v194_v5 = vld [vmem:[%s167_s11 + $0x10] sm:$0xff]  ;;  %594 = vmatprep.subr.bf16.mxu1 %v754_v7  ;;  %v756_v8 = vmov 0.0   ;;  %s539_s19 = sshll.u32 %s883_s5, 4  ;;  %vm440_vm2 = vcmask 64512  }
  0x3a   : > { %570 = vmatprep.mubr.msk.f32.mxu0 %vm199_vm0, %v192_v2  ;;  %v195_v6 = vld [vmem:[%s167_s11 + $0x18] sm:$0xff]  ;;  %580 = vmatprep.mubr.msk.f32.mxu1 %vm755_vm1, %v756_v8  ;;  %v196_v13 = vld [vmem:[%s957_s1] sm:$0xff]  ;;  %s189_s20 = scalar_lea.vmem [#allocation5], %s539_s19  ;;  %s553_s26 = sshll.u32 %s801_s16, 8 }
  0x3b   : > { %591 = vmatprep.subr.bf16.mxu0 %v590_v3  ;;  %s457_s22 = sshll.u32 %s189_s20, 4  ;;  %s913_s29 = scalar_lea.hbm %s959_s3, %s553_s26  ;;  %s908_s22 = int_to_ptr.vmem [resolvable:$true] %s457_s22 }
  0x3c   : > { %593 = vmatpush3.bf16.msra.mxu0 %v590_v3  ;;  %s444_s30 = scalar_lea.sflag [#allocation4], %s883_s5  ;;  %s683_s9 = scalar_lea.vmem %s908_s22, 256 }
  0x3d   : > { %p684_p6 = scmp.ne.s32.totalorder %s908_s22, %s683_s9  ;;  %p966_p10 = scmp.ne.s32.totalorder %s963_s24, 0 }
  0x3e   : > { %s757_s16 = smov [#allocation5]  }
  0x3f   : > { %571 = vmatmul.mubr.msk.f32.vlgmr.msra.gmra.mrb[0].mxu0 %vm199_vm0, %v193_v4  ;;  %p685_p11 = pnand %p684_p6, %p966_p10  ;;  %s687_s10 = sshll.u32 %s757_s16, 4  ;;  %s688_s10 = int_to_ptr.vmem [resolvable:$false] %s687_s10 }
  0x40   : > { %573 = vmatprep.mubr.msk.f32.mxu0 %vm199_vm0, %v194_v5  ;;  %s689_s11 = scalar_lea.vmem %s688_s10, 512  ;;  %p690_p8 = scmp.lt.s32.totalorder %s908_s22, %s688_s10 }
  0x41   : > { %p686_p12 = pneg %p685_p11  ;;  %p691_p9 = scmp.lt.s32.totalorder %s689_s11, %s683_s9 }
  0x43   : > { %574 = vmatmul.mubr.msk.f32.gmra.mrb[2].mxu0 %vm199_vm0, %v195_v6  ;;  %p692_p13 = por %p691_p9, %p690_p8 }
  0x45   : > { %p693_p1 = pnand %p692_p13, %p686_p12 }
 0x112   : > { %v572_v9 = vpop.f32.mrb[0].mxu0 }
 0x113   : > { %v278_v10 = vpop.f32.mrb[1].mxu0 }
 0x114   : > { %v595_v11 = vpack.c.bf16 %v572_v9, %v278_v10 }
 0x116   : > { %v575_v12 = vpop.f32.mrb[2].mxu0  ;;  %596 = vmatpush3.bf16.msra.mxu1 %v595_v11 }
 0x117   : > { %v288_v14 = vpop.f32.mrb[3].mxu0  ;;  %597 = vmatprep.subr.bf16.mxu1 %v754_v7 }
 0x118   : > { %v598_v15 = vpack.c.bf16 %v575_v12, %v288_v14 }
 0x119   : > { %581 = vmatmul.mubr.msk.f32.vlgmr.msra.gmra.mrb[0].mxu1 %vm199_vm0, %v196_v13 }
 0x11a   : > { %599 = vmatpush3.bf16.msra.mxu1 %v598_v15  ;;  %587 = vmatprep.mubr.msk.f32.mxu1 %vm755_vm1, %v756_v8 }
 0x11d   : > { %588 = vmatmul.mubr.msk.f32.vlgmr.msra.gmra.mrb[2].mxu1 %vm199_vm0, %v196_v13 }
 0x1ec   : > { %v366_v16 = vpop.f32.mrb[0].mxu1 }
 0x1ed   : > { %441 = vst.msk [vmem:[%s189_s20] sm:$0xff] %vm440_vm2, %v366_v16  ;;  %v582_v17 = vpop.f32.mrb[1].mxu1 }
 0x1f0   : > { %v436_v18 = vpop.f32.mrb[2].mxu1 }
 0x1f1   : > { %442 = vst.msk [vmem:[%s189_s20 + $0x8] sm:$0xff] %vm440_vm2, %v436_v18  ;;  %v589_v19 = vpop.f32.mrb[3].mxu1 }
 0x1f2   : > { %696 = shalt.err (!%p693_p1)
}
 0x1f3   : > { %s697_s4 = scalar_lea.hbm %s913_s29, 256  ;;  %s701_s8 = scalar_lea.hbm %s959_s3, 1024 }
 0x1f4   : > { %p698_p3 = scmp.ne.s32.totalorder %s913_s29, %s697_s4  ;;  %p702_p0 = scmp.lt.u32.totalorder %s913_s29, %s959_s3 }
 0x1f5   : > { %p703_p2 = scmp.lt.u32.totalorder %s701_s8, %s697_s4  ;;  %p705_p6 = scmp.lt.u32.totalorder %s697_s4, %s913_s29 }
 0x1f6   : > { %p699_p4 = pnand %p698_p3, %p966_p10 }
 0x1f7   : > { %p704_p7 = por %p703_p2, %p702_p0 }
 0x1f8   : > { %p700_p5 = pneg %p699_p4 }
 0x1f9   : > { %p706_p11 = por %p705_p6, %p704_p7 }
 0x1fb   : > { %p707_p12 = pnand %p706_p11, %p700_p5 }
 0x1fd   : > { %710 = shalt.err (!%p707_p12)
}
 0x1fe   : > { %s758_s19 = smov 128   ;;  %s759_s20 = smov 8  }
 0x1ff   : > { %602 = dma.vmem_to_hbm [thread:$0]  (%p966_p10), %s908_s22, 256, %s913_s29, %s444_s30, %s758_s19, %s758_s19, %s759_s20  }
 0x200 PF: > { %p613_p8 = scmp.ge.s32.totalorder %s749_s15, 2  ;;  %s472_s26 = sand.u32 1, %s737_s12  }
 0x201   : > { %p967_p9 = scmp.ne.s32.totalorder %s964_s25, 0  ;;  %s473_s27 = scalar_lea.sflag [#allocation4], %s472_s26 }
 0x203   : > { %p609_p13 = pnand %p613_p8, %p967_p9 }
 0x205   : > { %732 = dma.done.wait (!%p609_p13), %s473_s27, 256  }
 0x206   : > { %734 = vsyncadd (!%p609_p13), %s473_s27, 4294967040  ;;  %p16_p1 = scmp.ge.s32.totalorder %s805_s18, 6   ;;  %s968_s12 = smov %s741_s13 }
 0x207   : > { %s969_s13 = smov %s745_s14  ;;  %s970_s14 = smov %s817_s21 }
 0x208   : > { %s971_s15 = smov %s805_s18  ;;  %18 = sbr.rel (!%p16_p1) target bundleno = 5 (0x5), region = 77 }
 0x20f   :  { %478 = vsyncpa [#allocation3], 1 }
 0x210   :  { %480 = vsyncpa [#allocation3 + $0x1], 1 }
 0x211   :  { %481 = vsyncpa [#allocation4], 1 }
 0x212   :  { %483 = vsyncpa [#allocation4 + $0x1], 1 }

</bundles_post_ra>
